<compile_context>
chip_gen: v7x
topology: tpu7x:2x2x1
jax: 0.10.0
libtpu: 0.0.40
codegen_flags: <defaults>
</compile_context>

<pallas_src>
import functools

import jax
import jax.numpy as jnp
from jax.experimental import pallas as pl
from jax.experimental.pallas import tpu as pltpu


def _round_up(x, m):
    return (x + m - 1) // m * m


def _num_tensorcores():
    # v7x has 2 TensorCores per chip; v5e/v6e have 1. Only used to decide
    # whether to split a single big batch tile into >=2 parallel grid steps.
    try:
        kind = jax.devices()[0].device_kind.lower()
    except Exception:
        return 1
    return 2 if "v7" in kind else 1


def mlp_kernel(x_ref, w1_ref, b1_ref, w2_ref, b2_ref, w3_ref, b3_ref, o_ref):
    # fc1 + relu   (bf16 operands, f32 MXU accumulation; f32 epilogue)
    h = jnp.dot(x_ref[...], w1_ref[...], preferred_element_type=jnp.float32)
    h = jnp.maximum(h + b1_ref[...], 0.0)
    # fc2 + relu
    h = jnp.dot(h.astype(jnp.bfloat16), w2_ref[...],
                preferred_element_type=jnp.float32)
    h = jnp.maximum(h + b2_ref[...], 0.0)
    # fc3 (no activation) — narrow [tm, action_size] store (masked vst is cheap;
    # HBM writeback is the binding resource and this keeps it minimal).
    out = jnp.dot(h.astype(jnp.bfloat16), w3_ref[...],
                  preferred_element_type=jnp.float32)
    o_ref[...] = (out + b3_ref[...]).astype(o_ref.dtype)


@functools.partial(jax.jit, static_argnames=("num_cores", "tm_target"))
def _mlp_forward_jit(x, w1, b1, w2, b2, w3, b3, *, num_cores=1, tm_target=2048):
    B, state_size = x.shape
    action_size = w3.shape[1]

    # Pad the batch only to a sublane multiple (8) — never to tile granularity.
    b_pad = max(8, _round_up(B, 8))

    # Tile selection: biggest tile that fits the budget; on v7x keep >= 2 grid
    # steps for non-trivial batches so the "parallel" axis shards over 2 TCs.
    if b_pad <= tm_target:
        if num_cores >= 2 and b_pad >= 16:
            tm = _round_up(pl.cdiv(b_pad, 2), 8)
        else:
            tm = b_pad
    else:
        tm = tm_target
    grid = (pl.cdiv(b_pad, tm),)

    # Narrow bf16 input stream (no 8 -> 128 lane padding in HBM).
    xp = jnp.zeros((b_pad, state_size), jnp.bfloat16)
    xp = xp.at[:B, :].set(x.astype(jnp.bfloat16))

    x_spec = pl.BlockSpec((tm, state_size), lambda i: (i, 0))
    out_spec = pl.BlockSpec((tm, action_size), lambda i: (i, 0))
    pinned = lambda a: pl.BlockSpec(a.shape, lambda i: (0, 0))  # VMEM-resident

    out = pl.pallas_call(
        mlp_kernel,
        out_shape=jax.ShapeDtypeStruct((b_pad, action_size), jnp.float32),
        grid=grid,
        in_specs=[x_spec,
                  pinned(w1), pinned(b1),
                  pinned(w2), pinned(b2),
                  pinned(w3), pinned(b3)],
        out_specs=out_spec,
        compiler_params=pltpu.CompilerParams(
            dimension_semantics=("parallel",)),  # batch tiles over TCs (v7x)
    )(xp, w1, b1, w2, b2, w3, b3)

    return out[:B, :]


def prepare_params(params):
    """One-time prep (hoisted out of the per-call path): weights -> bf16,
    biases -> [1, out] f32. Reuse the result across forward calls."""
    w1, b1, w2, b2, w3, b3 = params
    wcast = lambda w: jnp.asarray(w, jnp.bfloat16)
    bcast = lambda b: jnp.asarray(b, jnp.float32).reshape(1, -1)
    return (wcast(w1), bcast(b1), wcast(w2), bcast(b2), wcast(w3), bcast(b3))


def mlp_forward(x, prepped_params, *, tm_target=2048):
    """x: [B, state_size] f32. Returns [B, action_size] f32."""
    return _mlp_forward_jit(x, *prepped_params,
                            num_cores=_num_tensorcores(), tm_target=tm_target)


def init_params(key, state_size, action_size, h1=64, h2=64):
    # Deterministic init mimicking nn.Linear's uniform(-1/sqrt(fan_in), +1/sqrt(fan_in)).
    # Weights stored as [in, out] so the kernel computes x @ W + b (== PyTorch x @ W.T + b).
    ks = jax.random.split(key, 6)

    def lin(kw, kb, fan_in, fan_out):
        bound = 1.0 / jnp.sqrt(fan_in)
        w = jax.random.uniform(kw, (fan_in, fan_out), jnp.float32, -bound, bound)
        b = jax.random.uniform(kb, (1, fan_out), jnp.float32, -bound, bound)
        return w, b

    w1, b1 = lin(ks[0], ks[1], state_size, h1)
    w2, b2 = lin(ks[2], ks[3], h1, h2)
    w3, b3 = lin(ks[4], ks[5], h2, action_size)
    return (w1, b1, w2, b2, w3, b3)


def _ref_forward(x, params):
    w1, b1, w2, b2, w3, b3 = params
    r = jnp.maximum(x @ w1 + b1, 0.0)
    r = jnp.maximum(r @ w2 + b2, 0.0)
    return r @ w3 + b3


if __name__ == "__main__":
    key = jax.random.PRNGKey(0)
    state_size, action_size = 8, 4

    kp, kx1, kx2 = jax.random.split(key, 3)
    params = init_params(kp, state_size, action_size, h1=64, h2=64)
    prepped = prepare_params(params)

    # Small batch (original toy shape) — single-tile path.
    x_small = jax.random.normal(kx1, (2, state_size), jnp.float32)
    out_small = jax.block_until_ready(mlp_forward(x_small, prepped))
    ref_small = _ref_forward(x_small, params)
    assert out_small.shape == (2, action_size)
    # bf16 operands / f32 accumulation vs f32 reference -> relaxed tolerance.
    assert jnp.allclose(out_small, ref_small, atol=5e-2, rtol=5e-2)

    # Larger batch — exercises 8-row padding and (on v7x) the 2-step grid.
    x_big = jax.random.normal(kx2, (600, state_size), jnp.float32)
    out_big = jax.block_until_ready(mlp_forward(x_big, prepped))
    ref_big = _ref_forward(x_big, params)
    assert out_big.shape == (600, action_size)
    assert jnp.allclose(out_big, ref_big, atol=5e-2, rtol=5e-2)

    print("KERNEL_OK")
</pallas_src>

<mosaic_0001>
module attributes {stable_mosaic.version = 11 : i64} {
  func.func @mlp_kernel(%arg0: i32, %arg1: memref<8x8xbf16, #tpu.memory_space<vmem>>, %arg2: memref<8x64xbf16, #tpu.memory_space<vmem>>, %arg3: memref<1x64xf32, #tpu.memory_space<vmem>>, %arg4: memref<64x64xbf16, #tpu.memory_space<vmem>>, %arg5: memref<1x64xf32, #tpu.memory_space<vmem>>, %arg6: memref<64x4xbf16, #tpu.memory_space<vmem>>, %arg7: memref<1x4xf32, #tpu.memory_space<vmem>>, %arg8: memref<8x4xf32, #tpu.memory_space<vmem>>) attributes {dimension_semantics = [#tpu.dimension_semantics<parallel>], iteration_bounds = array<i64: 1>, scalar_prefetch = 0 : i64, scratch_operands = 0 : i64, tpu.core_type = #tpu.core_type<tc>, window_params = [{transform_indices = @transform_0, window_bounds = array<i64: 8, 8>}, {pipeline_mode = #tpu.pipeline_mode<synchronous>, transform_indices = @transform_1, window_bounds = array<i64: 8, 64>}, {pipeline_mode = #tpu.pipeline_mode<synchronous>, transform_indices = @transform_2, window_bounds = array<i64: 1, 64>}, {pipeline_mode = #tpu.pipeline_mode<synchronous>, transform_indices = @transform_3, window_bounds = array<i64: 64, 64>}, {pipeline_mode = #tpu.pipeline_mode<synchronous>, transform_indices = @transform_4, window_bounds = array<i64: 1, 64>}, {pipeline_mode = #tpu.pipeline_mode<synchronous>, transform_indices = @transform_5, window_bounds = array<i64: 64, 4>}, {pipeline_mode = #tpu.pipeline_mode<synchronous>, transform_indices = @transform_6, window_bounds = array<i64: 1, 4>}, {transform_indices = @transform_7, window_bounds = array<i64: 8, 4>}]} {
    %c0 = arith.constant 0 : index
    %c0_0 = arith.constant 0 : index
    %0 = vector.load %arg1[%c0, %c0_0] : memref<8x8xbf16, #tpu.memory_space<vmem>>, vector<8x8xbf16>
    %c0_1 = arith.constant 0 : index
    %c0_2 = arith.constant 0 : index
    %1 = vector.load %arg2[%c0_1, %c0_2] : memref<8x64xbf16, #tpu.memory_space<vmem>>, vector<8x64xbf16>
    %cst = arith.constant dense<0.000000e+00> : vector<8x64xf32>
    %2 = tpu.matmul %0, %1, %cst {dimension_numbers = #tpu.dot_dimension_numbers<[1], [0], [0], [1], [0, 0, 1, 1], [], []>} : vector<8x8xbf16>, vector<8x64xbf16>, vector<8x64xf32> -> vector<8x64xf32>
    %c0_3 = arith.constant 0 : index
    %c0_4 = arith.constant 0 : index
    %3 = vector.load %arg3[%c0_3, %c0_4] : memref<1x64xf32, #tpu.memory_space<vmem>>, vector<1x64xf32>
    %4 = vector.broadcast %3 : vector<1x64xf32> to vector<8x64xf32>
    %5 = arith.addf %2, %4 : vector<8x64xf32>
    %cst_5 = arith.constant 0.000000e+00 : f32
    %6 = vector.broadcast %cst_5 : f32 to vector<8x64xf32>
    %7 = arith.maximumf %5, %6 : vector<8x64xf32>
    %8 = arith.truncf %7 : vector<8x64xf32> to vector<8x64xbf16>
    %c0_6 = arith.constant 0 : index
    %c0_7 = arith.constant 0 : index
    %9 = vector.load %arg4[%c0_6, %c0_7] : memref<64x64xbf16, #tpu.memory_space<vmem>>, vector<64x64xbf16>
    %cst_8 = arith.constant dense<0.000000e+00> : vector<8x64xf32>
    %10 = tpu.matmul %8, %9, %cst_8 {dimension_numbers = #tpu.dot_dimension_numbers<[1], [0], [0], [1], [0, 0, 1, 1], [], []>} : vector<8x64xbf16>, vector<64x64xbf16>, vector<8x64xf32> -> vector<8x64xf32>
    %c0_9 = arith.constant 0 : index
    %c0_10 = arith.constant 0 : index
    %11 = vector.load %arg5[%c0_9, %c0_10] : memref<1x64xf32, #tpu.memory_space<vmem>>, vector<1x64xf32>
    %12 = vector.broadcast %11 : vector<1x64xf32> to vector<8x64xf32>
    %13 = arith.addf %10, %12 : vector<8x64xf32>
    %cst_11 = arith.constant 0.000000e+00 : f32
    %14 = vector.broadcast %cst_11 : f32 to vector<8x64xf32>
    %15 = arith.maximumf %13, %14 : vector<8x64xf32>
    %16 = arith.truncf %15 : vector<8x64xf32> to vector<8x64xbf16>
    %c0_12 = arith.constant 0 : index
    %c0_13 = arith.constant 0 : index
    %17 = vector.load %arg6[%c0_12, %c0_13] : memref<64x4xbf16, #tpu.memory_space<vmem>>, vector<64x4xbf16>
    %cst_14 = arith.constant dense<0.000000e+00> : vector<8x4xf32>
    %18 = tpu.matmul %16, %17, %cst_14 {dimension_numbers = #tpu.dot_dimension_numbers<[1], [0], [0], [1], [0, 0, 1, 1], [], []>} : vector<8x64xbf16>, vector<64x4xbf16>, vector<8x4xf32> -> vector<8x4xf32>
    %c0_15 = arith.constant 0 : index
    %c0_16 = arith.constant 0 : index
    %19 = vector.load %arg7[%c0_15, %c0_16] : memref<1x4xf32, #tpu.memory_space<vmem>>, vector<1x4xf32>
    %20 = vector.broadcast %19 : vector<1x4xf32> to vector<8x4xf32>
    %21 = arith.addf %18, %20 : vector<8x4xf32>
    %c0_17 = arith.constant 0 : index
    %c0_18 = arith.constant 0 : index
    %22 = vector.load %arg8[%c0_17, %c0_18] : memref<8x4xf32, #tpu.memory_space<vmem>>, vector<8x4xf32>
    tpu.vector_store %arg8[%c0_17, %c0_18], %21 {strides = array<i32>} : memref<8x4xf32, #tpu.memory_space<vmem>>, vector<8x4xf32>,
    return
  }
  func.func @transform_0(%arg0: i32) -> (i32, i32) {
    %c0_i32 = arith.constant 0 : i32
    %c0_i32_0 = arith.constant 0 : i32
    return %arg0, %c0_i32 : i32, i32
  }
  func.func @transform_1(%arg0: i32) -> (i32, i32) {
    %c0_i32 = arith.constant 0 : i32
    %c0_i32_0 = arith.constant 0 : i32
    %c0_i32_1 = arith.constant 0 : i32
    return %c0_i32, %c0_i32_0 : i32, i32
  }
  func.func @transform_2(%arg0: i32) -> (i32, i32) {
    %c0_i32 = arith.constant 0 : i32
    %c0_i32_0 = arith.constant 0 : i32
    %c0_i32_1 = arith.constant 0 : i32
    return %c0_i32, %c0_i32_0 : i32, i32
  }
  func.func @transform_3(%arg0: i32) -> (i32, i32) {
    %c0_i32 = arith.constant 0 : i32
    %c0_i32_0 = arith.constant 0 : i32
    %c0_i32_1 = arith.constant 0 : i32
    return %c0_i32, %c0_i32_0 : i32, i32
  }
  func.func @transform_4(%arg0: i32) -> (i32, i32) {
    %c0_i32 = arith.constant 0 : i32
    %c0_i32_0 = arith.constant 0 : i32
    %c0_i32_1 = arith.constant 0 : i32
    return %c0_i32, %c0_i32_0 : i32, i32
  }
  func.func @transform_5(%arg0: i32) -> (i32, i32) {
    %c0_i32 = arith.constant 0 : i32
    %c0_i32_0 = arith.constant 0 : i32
    %c0_i32_1 = arith.constant 0 : i32
    return %c0_i32, %c0_i32_0 : i32, i32
  }
  func.func @transform_6(%arg0: i32) -> (i32, i32) {
    %c0_i32 = arith.constant 0 : i32
    %c0_i32_0 = arith.constant 0 : i32
    %c0_i32_1 = arith.constant 0 : i32
    return %c0_i32, %c0_i32_0 : i32, i32
  }
  func.func @transform_7(%arg0: i32) -> (i32, i32) {
    %c0_i32 = arith.constant 0 : i32
    %c0_i32_0 = arith.constant 0 : i32
    return %arg0, %c0_i32 : i32, i32
  }
}

</mosaic_0001>

<bundles_post_ra>
// kernel: _mlp_forward_jit.1
= control target key start
LH: loop header
LB: loop body
LE: loop exit
PB: predicated region body
PF: predicated region fallthrough
CT: control target
= control target key end

     0   :  { %vm40_vm0 = vcmask 1043456   ;;  %v325_v0 = vmov 0.0   ;;  %vm326_vm1 = vmmov 0   ;;  %vm36_vm2 = vcmask 64512   ;;  %s411_s1 = inlined_call_operand.vmem [shape: bf16[8,64], index: 1, kind: input, shape index: {}]   ;;  %s412_s0 = inlined_call_operand.vmem [shape: bf16[8,8], index: 0, kind: input, shape index: {}]   ;;  %s413_s3 = inlined_call_operand.vmem [shape: bf16[64,64], index: 3, kind: input, shape index: {}]   ;;  %s414_s5 = inlined_call_operand.vmem [shape: bf16[64,4], index: 5, kind: input, shape index: {}]   ;;  %s415_s2 = inlined_call_operand.vmem [shape: f32[1,64], index: 2, kind: input, shape index: {}]   ;;  %s416_s4 = inlined_call_operand.vmem [shape: f32[1,64], index: 4, kind: input, shape index: {}]   ;;  %s417_s6 = inlined_call_operand.vmem [shape: f32[1,4], index: 6, kind: input, shape index: {}]   ;;  %s418_s7 = inlined_call_operand.vmem [shape: f32[8,4], index: 7, kind: output, shape index: {}]  }
   0x1   :  { %285 = vmatprep.subr.bf16.mxu0 %v325_v0  ;;  %v28_v1 = vld [vmem:[%s411_s1] sm:$0xf]  ;;  %287 = vmatprep.mubr.msk.bf16.mxu0 %vm326_vm1, %v325_v0  ;;  %v318_v5 = vld [vmem:[%s413_s3 + $0x8] sm:$0xff]   ;;  %v319_v6 = vld [vmem:[%s413_s3 + $0x10] sm:$0xff]   ;;  %vm125_vm3 = vcmask 523264   ;;  %vm253_vm4 = vcmask 31744  }
   0x2   :  { %v42_v2 = vsel %vm40_vm0, %v28_v1, 0  ;;  %291 = vmatprep.subr.bf16.mxu1 %v325_v0  ;;  %v317_v3 = vld [vmem:[%s413_s3] sm:$0xff]   ;;  %299 = vmatprep.mubr.msk.bf16.mxu1 %vm326_vm1, %v325_v0  ;;  %v320_v7 = vld [vmem:[%s413_s3 + $0x18] sm:$0xff]   ;;  %v322_v9 = vld [vmem:[%s414_s5 + $0x8] sm:$0xff]  }
   0x3   :  { %286 = vmatpush3.bf16.msra.mxu0 %v42_v2  ;;  %v27_v4 = vld [vmem:[%s412_s0] sm:$0xf]  ;;  %292 = vmatpush3.bf16.msra.mxu1 %v317_v3  ;;  %v323_v18 = vld [vmem:[%s414_s5 + $0x10] sm:$0xff]   ;;  %v324_v19 = vld [vmem:[%s414_s5 + $0x18] sm:$0xff]  }
   0x4   :  { %303 = vmatprep.subr.bf16.mxu0 %v325_v0  ;;  %293 = vmatprep.subr.bf16.mxu1 %v325_v0  ;;  %v321_v8 = vld [vmem:[%s414_s5] sm:$0xff]  }
   0x5   :  { %v259_v10 = vld [vmem:[%s415_s2] ss:$0 sm:$0xff] }
   0x6   :  { %288 = vmatmul.mubr.msk.bf16.vlgmr.msra.gmra.mrb[0].mxu0 %vm36_vm2, %v27_v4  ;;  %v261_v20 = vld [vmem:[%s416_s4] ss:$0 sm:$0xff] }
   0x7   :  { %311 = vmatprep.mubr.msk.bf16.mxu0 %vm326_vm1, %v325_v0  ;;  %294 = vmatpush3.bf16.msra.mxu1 %v318_v5  ;;  %v267_v28 = vld [vmem:[%s417_s6] ss:$0 sm:$0xff] }
   0x8   :  { %295 = vmatprep.subr.bf16.mxu1 %v325_v0  ;;  %304 = vmatpush3.bf16.msra.mxu0 %v321_v8 }
   0x9   :  { %305 = vmatprep.subr.bf16.mxu0 %v325_v0 }
   0xb   :  { %296 = vmatpush3.bf16.msra.mxu1 %v319_v6 }
   0xc   :  { %297 = vmatprep.subr.bf16.mxu1 %v325_v0  ;;  %306 = vmatpush3.bf16.msra.mxu0 %v322_v9 }
   0xd   :  { %307 = vmatprep.subr.bf16.mxu0 %v325_v0 }
   0xf   :  { %298 = vmatpush3.bf16.msra.mxu1 %v320_v7 }
  0x10   :  { %308 = vmatpush3.bf16.msra.mxu0 %v323_v18 }
  0x11   :  { %309 = vmatprep.subr.bf16.mxu0 %v325_v0 }
  0x14   :  { %310 = vmatpush3.bf16.msra.mxu0 %v324_v19 }
  0xd9   :  { %v78_v11 = vpop.f32.mrb[0].mxu0 }
  0xda   :  { %v79_v12 = vadd.f32 %v259_v10, %v78_v11  ;;  %v289_v13 = vpop.f32.mrb[1].mxu0 }
  0xdb   :  { %v81_v14 = vpop.f32.mrb[2].mxu0 }
  0xdc   :  { %v84_v15 = vmax.f32 %v79_v12, 0.0  ;;  %v290_v16 = vpop.f32.mrb[3].mxu0 }
  0xde   :  { %v85_v17 = vpack.c.bf16 %v84_v15, %v84_v15 }
  0xe0   :  { %300 = vmatmul.mubr.msk.bf16.vlgmr.msra.gmra.mrb[0].mxu1 %vm125_vm3, %v85_v17 }
 0x1b3   :  { %v163_v21 = vpop.f32.mrb[0].mxu1 }
 0x1b4   :  { %v164_v22 = vadd.f32 %v261_v20, %v163_v21  ;;  %v301_v23 = vpop.f32.mrb[1].mxu1 }
 0x1b5   :  { %v166_v24 = vpop.f32.mrb[2].mxu1 }
 0x1b6   :  { %v169_v25 = vmax.f32 %v164_v22, 0.0  ;;  %v302_v26 = vpop.f32.mrb[3].mxu1 }
 0x1b8   :  { %v170_v27 = vpack.c.bf16 %v169_v25, %v169_v25 }
 0x1ba   :  { %312 = vmatmul.mubr.msk.bf16.vlgmr.msra.gmra.mrb[4].mxu0 %vm125_vm3, %v170_v27 }
 0x28d   :  { %v247_v29 = vpop.f32.mrb[4].mxu0 }
 0x28e   :  { %v248_v30 = vadd.f32 %v267_v28, %v247_v29  ;;  %v313_v31 = vpop.f32.mrb[5].mxu0 }
 0x28f   :  { %v250_v32 = vpop.f32.mrb[6].mxu0 }
 0x290   :  { %254 = vst.msk [vmem:[%s418_s7] sm:$0xff] %vm253_vm4, %v248_v30  ;;  %v314_v33 = vpop.f32.mrb[7].mxu0 }

</bundles_post_ra>
